<compile_context>
chip_gen: v7x
topology: tpu7x:2x2x1
jax: 0.10.0
libtpu: 0.0.40
codegen_flags: <defaults>
</compile_context>

<pallas_src>
import math
from functools import partial

import jax
import jax.numpy as jnp
from jax import lax
from jax.experimental import pallas as pl
from jax.experimental.pallas import tpu as pltpu

_INV_SQRT2 = 1.0 / math.sqrt(2.0)


def _mlp_kernel(x_ref, w1t_ref, b1_ref, w2t_ref, b2_ref, o_ref):
    # x_ref   : (TM, D)  tile of flattened input rows (native dtype)
    # w1t_ref : (D, D)   lin1 weight, (in, out) layout, VMEM-resident
    # b1_ref  : (1, D)
    # w2t_ref : (D, D)   lin2 weight, (in, out) layout, VMEM-resident
    # b2_ref  : (1, D)
    # o_ref   : (TM, D)
    x = x_ref[...]

    # lin1 on the MXU: native-dtype operands, f32 accumulation.
    h = jnp.dot(x, w1t_ref[...], preferred_element_type=jnp.float32)
    h = h + b1_ref[...].astype(jnp.float32)

    # Exact GELU (matches torch.nn.GELU(approximate='none')), kept in f32.
    h = 0.5 * h * (1.0 + lax.erf(h * _INV_SQRT2))

    # lin2: downcast only the MXU operand; accumulate in f32.
    o = jnp.dot(h.astype(w2t_ref.dtype), w2t_ref[...],
                preferred_element_type=jnp.float32)
    o = o + b2_ref[...].astype(jnp.float32)

    o_ref[...] = o.astype(o_ref.dtype)


def _round_up(n, m):
    return ((n + m - 1) // m) * m


@partial(jax.jit, static_argnames=("block_rows", "vmem_limit_bytes"))
def mlp_pallas(x, w1t, b1, w2t, b2, *, block_rows=256,
               vmem_limit_bytes=64 * 1024 * 1024):
    """MLP forward: GELU(x @ w1t + b1) @ w2t + b2.

    x     : (..., D)   Linear acts on the last axis (PyTorch semantics).
    w1t   : (D, D)     lin1 weight already transposed to (in, out).
    w2t   : (D, D)     lin2 weight already transposed to (in, out).
    b1,b2 : (D,)
    """
    *lead, D = x.shape
    N = math.prod(lead) if lead else 1
    x2 = x.reshape(N, D)

    # Row tile: large enough to keep the MXU busy, clamped for tiny N,
    # always a multiple of 8 (sublane). Pad rows so the grid divides evenly.
    tm = min(block_rows, _round_up(N, 8))
    n_pad = _round_up(N, tm)
    if n_pad != N:
        x2 = jnp.pad(x2, ((0, n_pad - N), (0, 0)))

    b1_2d = b1.reshape(1, D)
    b2_2d = b2.reshape(1, D)

    # Weights / biases are identical for every grid step -> single-buffer them
    # so VMEM goes to bigger row tiles instead of a redundant second copy.
    def w_spec():
        return pl.BlockSpec((D, D), lambda i: (0, 0),
                            pipeline_mode=pl.Buffered(buffer_count=1))

    def b_spec():
        return pl.BlockSpec((1, D), lambda i: (0, 0),
                            pipeline_mode=pl.Buffered(buffer_count=1))

    out = pl.pallas_call(
        _mlp_kernel,
        out_shape=jax.ShapeDtypeStruct((n_pad, D), x.dtype),
        grid_spec=pltpu.PrefetchScalarGridSpec(
            num_scalar_prefetch=0,
            grid=(n_pad // tm,),
            in_specs=[
                pl.BlockSpec((tm, D), lambda i: (i, 0)),  # x rows (pipelined)
                w_spec(),   # W1^T, resident
                b_spec(),   # b1
                w_spec(),   # W2^T, resident
                b_spec(),   # b2
            ],
            out_specs=pl.BlockSpec((tm, D), lambda i: (i, 0)),
        ),
        compiler_params=pltpu.CompilerParams(
            dimension_semantics=("parallel",),   # shard row tiles across TCs
            vmem_limit_bytes=vmem_limit_bytes,
        ),
    )(x2, w1t, b1_2d, w2t, b2_2d)

    if n_pad != N:
        out = out[:N]
    return out.reshape(*lead, D)


def _reference_mlp(x, w1, b1, w2, b2):
    # w1, w2 in PyTorch (out, in) convention.
    h = jnp.einsum("...d,od->...o", x, w1) + b1
    h = 0.5 * h * (1.0 + lax.erf(h * _INV_SQRT2))
    o = jnp.einsum("...d,od->...o", h, w2) + b2
    return o


if __name__ == "__main__":
    # Small demo shape: batch=2, tokens=8, dim=32.
    B, S, D = 2, 8, 32
    key = jax.random.PRNGKey(0)
    kx, kw1, kb1, kw2, kb2 = jax.random.split(key, 5)

    x = jax.random.normal(kx, (B, S, D), dtype=jnp.float32)

    # Deterministic params mimicking torch.nn.Linear default init,
    # weights stored (out, in) like PyTorch.
    bound = 1.0 / math.sqrt(D)
    w1 = jax.random.uniform(kw1, (D, D), jnp.float32, -bound, bound)
    b1 = jax.random.uniform(kb1, (D,), jnp.float32, -bound, bound)
    w2 = jax.random.uniform(kw2, (D, D), jnp.float32, -bound, bound)
    b2 = jax.random.uniform(kb2, (D,), jnp.float32, -bound, bound)

    # One-time layout prep (outside the jit hot path): transpose the PyTorch
    # (out, in) weights to (in, out) so the kernel never re-transposes.
    w1t = w1.T
    w2t = w2.T

    out = mlp_pallas(x, w1t, b1, w2t, b2)
    out = jax.block_until_ready(out)

    ref = _reference_mlp(x, w1, b1, w2, b2)
    assert out.shape == (B, S, D)
    assert jnp.allclose(out, ref, atol=1e-5, rtol=1e-5), "mismatch vs reference"

    print("KERNEL_OK")
</pallas_src>

<mosaic_0001>
module attributes {stable_mosaic.version = 11 : i64} {
  func.func @_mlp_kernel(%arg0: i32, %arg1: memref<16x32xf32, #tpu.memory_space<vmem>>, %arg2: memref<32x32xf32, #tpu.memory_space<vmem>>, %arg3: memref<1x32xf32, #tpu.memory_space<vmem>>, %arg4: memref<32x32xf32, #tpu.memory_space<vmem>>, %arg5: memref<1x32xf32, #tpu.memory_space<vmem>>, %arg6: memref<16x32xf32, #tpu.memory_space<vmem>>) attributes {dimension_semantics = [#tpu.dimension_semantics<parallel>], iteration_bounds = array<i64: 1>, scalar_prefetch = 0 : i64, scratch_operands = 0 : i64, tpu.core_type = #tpu.core_type<tc>, window_params = [{transform_indices = @transform_0, window_bounds = array<i64: 16, 32>}, {pipeline_mode = #tpu.pipeline_mode<synchronous>, transform_indices = @transform_1, window_bounds = array<i64: 32, 32>}, {pipeline_mode = #tpu.pipeline_mode<synchronous>, transform_indices = @transform_2, window_bounds = array<i64: 1, 32>}, {pipeline_mode = #tpu.pipeline_mode<synchronous>, transform_indices = @transform_3, window_bounds = array<i64: 32, 32>}, {pipeline_mode = #tpu.pipeline_mode<synchronous>, transform_indices = @transform_4, window_bounds = array<i64: 1, 32>}, {transform_indices = @transform_5, window_bounds = array<i64: 16, 32>}]} {
    %c0 = arith.constant 0 : index
    %c0_0 = arith.constant 0 : index
    %0 = vector.load %arg1[%c0, %c0_0] : memref<16x32xf32, #tpu.memory_space<vmem>>, vector<16x32xf32>
    %c0_1 = arith.constant 0 : index
    %c0_2 = arith.constant 0 : index
    %1 = vector.load %arg2[%c0_1, %c0_2] : memref<32x32xf32, #tpu.memory_space<vmem>>, vector<32x32xf32>
    %cst = arith.constant dense<0.000000e+00> : vector<16x32xf32>
    %2 = tpu.matmul %0, %1, %cst {dimension_numbers = #tpu.dot_dimension_numbers<[1], [0], [0], [1], [0, 0, 1, 1], [], []>} : vector<16x32xf32>, vector<32x32xf32>, vector<16x32xf32> -> vector<16x32xf32>
    %c0_3 = arith.constant 0 : index
    %c0_4 = arith.constant 0 : index
    %3 = vector.load %arg3[%c0_3, %c0_4] : memref<1x32xf32, #tpu.memory_space<vmem>>, vector<1x32xf32>
    %4 = vector.broadcast %3 : vector<1x32xf32> to vector<16x32xf32>
    %5 = arith.addf %2, %4 : vector<16x32xf32>
    %cst_5 = arith.constant 5.000000e-01 : f32
    %6 = vector.broadcast %cst_5 : f32 to vector<16x32xf32>
    %7 = arith.mulf %6, %5 : vector<16x32xf32>
    %cst_6 = arith.constant 0.707106769 : f32
    %8 = vector.broadcast %cst_6 : f32 to vector<16x32xf32>
    %9 = arith.mulf %5, %8 : vector<16x32xf32>
    %10 = math.erf %9 : vector<16x32xf32>
    %cst_7 = arith.constant 1.000000e+00 : f32
    %11 = vector.broadcast %cst_7 : f32 to vector<16x32xf32>
    %12 = arith.addf %11, %10 : vector<16x32xf32>
    %13 = arith.mulf %7, %12 : vector<16x32xf32>
    %c0_8 = arith.constant 0 : index
    %c0_9 = arith.constant 0 : index
    %14 = vector.load %arg4[%c0_8, %c0_9] : memref<32x32xf32, #tpu.memory_space<vmem>>, vector<32x32xf32>
    %cst_10 = arith.constant dense<0.000000e+00> : vector<16x32xf32>
    %15 = tpu.matmul %13, %14, %cst_10 {dimension_numbers = #tpu.dot_dimension_numbers<[1], [0], [0], [1], [0, 0, 1, 1], [], []>} : vector<16x32xf32>, vector<32x32xf32>, vector<16x32xf32> -> vector<16x32xf32>
    %c0_11 = arith.constant 0 : index
    %c0_12 = arith.constant 0 : index
    %16 = vector.load %arg5[%c0_11, %c0_12] : memref<1x32xf32, #tpu.memory_space<vmem>>, vector<1x32xf32>
    %17 = vector.broadcast %16 : vector<1x32xf32> to vector<16x32xf32>
    %18 = arith.addf %15, %17 : vector<16x32xf32>
    %c0_13 = arith.constant 0 : index
    %c0_14 = arith.constant 0 : index
    %19 = vector.load %arg6[%c0_13, %c0_14] : memref<16x32xf32, #tpu.memory_space<vmem>>, vector<16x32xf32>
    tpu.vector_store %arg6[%c0_13, %c0_14], %18 {strides = array<i32>} : memref<16x32xf32, #tpu.memory_space<vmem>>, vector<16x32xf32>,
    return
  }
  func.func @transform_0(%arg0: i32) -> (i32, i32) {
    %c0_i32 = arith.constant 0 : i32
    %c0_i32_0 = arith.constant 0 : i32
    return %arg0, %c0_i32 : i32, i32
  }
  func.func @transform_1(%arg0: i32) -> (i32, i32) {
    %c0_i32 = arith.constant 0 : i32
    %c0_i32_0 = arith.constant 0 : i32
    %c0_i32_1 = arith.constant 0 : i32
    return %c0_i32, %c0_i32_0 : i32, i32
  }
  func.func @transform_2(%arg0: i32) -> (i32, i32) {
    %c0_i32 = arith.constant 0 : i32
    %c0_i32_0 = arith.constant 0 : i32
    %c0_i32_1 = arith.constant 0 : i32
    return %c0_i32, %c0_i32_0 : i32, i32
  }
  func.func @transform_3(%arg0: i32) -> (i32, i32) {
    %c0_i32 = arith.constant 0 : i32
    %c0_i32_0 = arith.constant 0 : i32
    %c0_i32_1 = arith.constant 0 : i32
    return %c0_i32, %c0_i32_0 : i32, i32
  }
  func.func @transform_4(%arg0: i32) -> (i32, i32) {
    %c0_i32 = arith.constant 0 : i32
    %c0_i32_0 = arith.constant 0 : i32
    %c0_i32_1 = arith.constant 0 : i32
    return %c0_i32, %c0_i32_0 : i32, i32
  }
  func.func @transform_5(%arg0: i32) -> (i32, i32) {
    %c0_i32 = arith.constant 0 : i32
    %c0_i32_0 = arith.constant 0 : i32
    return %arg0, %c0_i32 : i32, i32
  }
}

</mosaic_0001>

<bundles_post_ra>
// kernel: mlp_pallas.1
= control target key start
LH: loop header
LB: loop body
LE: loop exit
PB: predicated region body
PF: predicated region fallthrough
CT: control target
= control target key end

     0   :  { %10 = vsyncpa [#allocation3], 0  ;;  %s646_s0 = inlined_call_operand.hbm [shape: f32[16,32], index: 0, kind: input, shape index: {}]   ;;  %s647_s1 = inlined_call_operand.hbm [shape: f32[32,32], index: 1, kind: input, shape index: {}]   ;;  %s648_s2 = inlined_call_operand.hbm [shape: f32[1,32], index: 2, kind: input, shape index: {}]   ;;  %s649_s3 = inlined_call_operand.hbm [shape: f32[32,32], index: 3, kind: input, shape index: {}]   ;;  %s650_s4 = inlined_call_operand.hbm [shape: f32[1,32], index: 4, kind: input, shape index: {}]   ;;  %s651_s5 = inlined_call_operand.hbm [shape: f32[16,32], index: 5, kind: output, shape index: {}]  }
   0x1   :  { %11 = vsyncpa [#allocation6], 0 }
   0x2   :  { %12 = vsyncpa [#allocation9], 0 }
   0x3   :  { %13 = vsyncpa [#allocation4], 0  ;;  %s511_s18 = smov [#allocation5]   ;;  %s512_s20 = smov [#allocation8]  }
   0x4   :  { %s31_s19 = sshll.u32 %s511_s18, 4  ;;  %s53_s21 = sshll.u32 %s512_s20, 4  ;;  %s32_s19 = int_to_ptr.vmem [resolvable:$true] %s31_s19  ;;  %s549_s21 = int_to_ptr.vmem [resolvable:$true] %s53_s21 }
   0x5   :  { %s371_s24 = scalar_lea.hbm %s647_s1, 512 }
   0x6   :  { %p372_p0 = scmp.ne.s32.totalorder %s647_s1, %s371_s24  ;;  %p375_p1 = scmp.lt.u32.totalorder %s371_s24, %s647_s1 }
   0x8   :  { %p377_p2 = pnand %p375_p1, %p372_p0 }
   0xa   :  { %380 = shalt.err (!%p377_p2)
}
   0xb   :  { %s381_s29 = scalar_lea.vmem %s32_s19, 512  ;;  %p386_p4 = scmp.lt.s32.totalorder %s32_s19, %s32_s19 }
   0xc   :  { %p382_p3 = scmp.ne.s32.totalorder %s32_s19, %s381_s29  ;;  %p387_p5 = scmp.lt.s32.totalorder %s381_s29, %s381_s29 }
   0xe   :  { %p388_p6 = por %p387_p5, %p386_p4 }
  0x10   :  { %p389_p7 = pnand %p388_p6, %p382_p3 }
  0x12   :  { %392 = shalt.err (!%p389_p7)
}
  0x13   :  { %s513_s30 = smov 128   ;;  %s514_s6 = smov 8  }
  0x14   :  { %37 = dma.hbm_to_vmem [thread:$0]  %s647_s1, 512, %s32_s19, [#allocation6], %s513_s30, %s513_s30, %s514_s6  }
  0x15   :  { %s393_s11 = scalar_lea.hbm %s649_s3, 512 }
  0x16   :  { %p394_p8 = scmp.ne.s32.totalorder %s649_s3, %s393_s11  ;;  %p397_p9 = scmp.lt.u32.totalorder %s393_s11, %s649_s3 }
  0x18   :  { %p399_p10 = pnand %p397_p9, %p394_p8 }
  0x1a   :  { %402 = shalt.err (!%p399_p10)
}
  0x1b   :  { %s403_s16 = scalar_lea.vmem %s549_s21, 512  ;;  %p408_p12 = scmp.lt.s32.totalorder %s549_s21, %s549_s21 }
  0x1c   :  { %p404_p11 = scmp.ne.s32.totalorder %s549_s21, %s403_s16  ;;  %p409_p13 = scmp.lt.s32.totalorder %s403_s16, %s403_s16 }
  0x1e   :  { %p410_p0 = por %p409_p13, %p408_p12 }
  0x20   :  { %p411_p1 = pnand %p410_p0, %p404_p11 }
  0x22   :  { %414 = shalt.err (!%p411_p1)
}
  0x23   :  { %59 = dma.hbm_to_vmem [thread:$0]  %s649_s3, 512, %s549_s21, [#allocation9], %s513_s30, %s513_s30, %s514_s6  }
  0x24   :  { %s515_s18 = smov [#allocation2]   ;;  %s516_s20 = smov [#allocation7]  }
  0x25   :  { %s19_s19 = sshll.u32 %s515_s18, 4  ;;  %s44_s22 = sshll.u32 %s516_s20, 4  ;;  %s20_s19 = int_to_ptr.vmem [resolvable:$true] %s19_s19  ;;  %s45_s22 = int_to_ptr.vmem [resolvable:$true] %s44_s22 }
  0x26   :  { %s415_s25 = scalar_lea.hbm %s646_s0, 256 }
  0x27   :  { %p416_p2 = scmp.ne.s32.totalorder %s646_s0, %s415_s25  ;;  %p419_p3 = scmp.lt.u32.totalorder %s415_s25, %s646_s0 }
  0x29   :  { %p421_p4 = pnand %p419_p3, %p416_p2 }
  0x2b   :  { %424 = shalt.err (!%p421_p4)
}
  0x2c   :  { %s425_s3 = scalar_lea.vmem %s20_s19, 256  ;;  %p430_p6 = scmp.lt.s32.totalorder %s20_s19, %s20_s19 }
  0x2d   :  { %p426_p5 = scmp.ne.s32.totalorder %s20_s19, %s425_s3  ;;  %p431_p7 = scmp.lt.s32.totalorder %s425_s3, %s425_s3 }
  0x2f   :  { %p432_p8 = por %p431_p7, %p430_p6 }
  0x31   :  { %p433_p9 = pnand %p432_p8, %p426_p5 }
  0x33   :  { %436 = shalt.err (!%p433_p9)
}
  0x34   :  { %25 = dma.hbm_to_vmem [thread:$0]  %s646_s0, 256, %s20_s19, [#allocation3], %s513_s30, %s513_s30, %s514_s6  }
  0x35   :  { %s437_s10 = scalar_lea.hbm %s648_s2, 16 }
  0x36   :  { %p438_p10 = scmp.ne.s32.totalorder %s648_s2, %s437_s10  ;;  %p441_p11 = scmp.lt.u32.totalorder %s437_s10, %s648_s2 }
  0x38   :  { %p443_p12 = pnand %p441_p11, %p438_p10 }
  0x3a   :  { %446 = shalt.err (!%p443_p12)
}
  0x3b   :  { %s447_s15 = scalar_lea.vmem %s45_s22, 16  ;;  %s451_s16 = scalar_lea.vmem %s45_s22, 32 }
  0x3c   :  { %p448_p13 = scmp.ne.s32.totalorder %s45_s22, %s447_s15  ;;  %p452_p0 = scmp.lt.s32.totalorder %s45_s22, %s45_s22 }
  0x3d   :  { %p453_p1 = scmp.lt.s32.totalorder %s451_s16, %s447_s15 }
  0x3f   :  { %p454_p2 = por %p453_p1, %p452_p0 }
  0x41   :  { %p455_p3 = pnand %p454_p2, %p448_p13 }
  0x43   :  { %458 = shalt.err (!%p455_p3)
}
  0x44   :  { %47 = dma.hbm_to_vmem [thread:$0]  %s648_s2, 16, %s45_s22, [#allocation6]  }
  0x45   :  { %s517_s17 = smov [#allocation10]   ;;  %s459_s23 = scalar_lea.hbm %s650_s4, 16 }
  0x46   :  { %s66_s18 = sshll.u32 %s517_s17, 4  ;;  %p460_p4 = scmp.ne.s32.totalorder %s650_s4, %s459_s23  ;;  %s67_s18 = int_to_ptr.vmem [resolvable:$true] %s66_s18 }
  0x47   :  { %p463_p5 = scmp.lt.u32.totalorder %s459_s23, %s650_s4 }
  0x49   :  { %p465_p6 = pnand %p463_p5, %p460_p4 }
  0x4b   :  { %468 = shalt.err (!%p465_p6)
}
  0x4c   :  { %s469_s28 = scalar_lea.vmem %s67_s18, 16  ;;  %s473_s2 = scalar_lea.vmem %s67_s18, 32 }
  0x4d   :  { %p470_p7 = scmp.ne.s32.totalorder %s67_s18, %s469_s28  ;;  %p474_p8 = scmp.lt.s32.totalorder %s67_s18, %s67_s18 }
  0x4e   :  { %p475_p9 = scmp.lt.s32.totalorder %s473_s2, %s469_s28 }
  0x50   :  { %p476_p10 = por %p475_p9, %p474_p8 }
  0x52   :  { %p477_p11 = pnand %p476_p10, %p470_p7 }
  0x54   :  { %480 = shalt.err (!%p477_p11)
}
  0x55   :  { %69 = dma.hbm_to_vmem [thread:$0]  %s650_s4, 16, %s67_s18, [#allocation9]  }
  0x56   :  { %503 = dma.done.wait [#allocation3], 256  }
  0x57   :  { %504 = vsyncadd [#allocation3], 4294967040 }
  0x58   :  { %505 = dma.done.wait [#allocation6], 528  }
  0x59   :  { %506 = vsyncadd [#allocation6], 4294966768 }
  0x5a   :  { %507 = dma.done.wait [#allocation9], 528  }
  0x5b   :  { %508 = vsyncadd [#allocation9], 4294966768  ;;  %vm98_vm0 = vcmask 261120   ;;  %v87_v0 = vld [vmem:[#allocation5] sm:$0xff]  ;;  %v88_v1 = vld [vmem:[#allocation5 + $0x8] sm:$0xff]  ;;  %s518_s4 = smov [#allocation11]  }
  0x5c   :  { %v89_v2 = vld [vmem:[#allocation5 + $0x10] sm:$0xff]  ;;  %v343_v3 = vpack.c.bf16 %v88_v1, %v87_v0  ;;  %v90_v4 = vld [vmem:[#allocation5 + $0x18] sm:$0xff]  ;;  %v190_v8 = vld [vmem:[#allocation8] sm:$0xff]  ;;  %s289_s3 = sshll.u32 %s518_s4, 4  ;;  %s290_s3 = int_to_ptr.vmem [resolvable:$true] %s289_s3 }
  0x5d   :  { %v85_v5 = vld [vmem:[#allocation2] sm:$0xff]  ;;  %v347_v6 = vpack.c.bf16 %v90_v4, %v89_v2  ;;  %v86_v7 = vld [vmem:[#allocation2 + $0x8] sm:$0xff]  ;;  %v303_v14 = vld [vmem:[#allocation7] ss:$0 sm:$0xff]  ;;  %s481_s21 = scalar_lea.vmem %s290_s3, 256  ;;  %p486_p13 = scmp.lt.s32.totalorder %s290_s3, %s290_s3 }
  0x5e   :  { %329 = vmatprep.mubr.msk.f32.mxu0 %vm98_vm0, %v85_v5  ;;  %344 = vmatprep.subr.bf16.mxu0 %v343_v3  ;;  %v191_v9 = vld [vmem:[#allocation8 + $0x8] sm:$0xff]  ;;  %v192_v11 = vld [vmem:[#allocation8 + $0x10] sm:$0xff]  ;;  %v193_v12 = vld [vmem:[#allocation8 + $0x18] sm:$0xff]  ;;  %p482_p12 = scmp.ne.s32.totalorder %s290_s3, %s481_s21  ;;  %p487_p0 = scmp.lt.s32.totalorder %s481_s21, %s481_s21 }
  0x5f   :  { %346 = vmatpush3.bf16.msra.mxu0 %v343_v3  ;;  %v351_v10 = vpack.c.bf16 %v191_v9, %v190_v8  ;;  %v355_v13 = vpack.c.bf16 %v193_v12, %v192_v11  ;;  %v306_v29 = vld [vmem:[#allocation10] ss:$0 sm:$0xff] }
  0x60   :  { %348 = vmatprep.subr.bf16.mxu0 %v347_v6  ;;  %p488_p1 = por %p487_p0, %p486_p13 }
  0x61   :  { %352 = vmatprep.subr.bf16.mxu1 %v351_v10 }
  0x62   :  { %354 = vmatpush3.bf16.msra.mxu1 %v351_v10  ;;  %p489_p2 = pnand %p488_p1, %p482_p12 }
  0x63   :  { %350 = vmatpush3.bf16.msra.mxu0 %v347_v6  ;;  %356 = vmatprep.subr.bf16.mxu1 %v355_v13 }
  0x66   :  { %330 = vmatmul.mubr.msk.f32.vlgmr.msra.gmra.mrb[0].mxu0 %vm98_vm0, %v86_v7  ;;  %358 = vmatpush3.bf16.msra.mxu1 %v355_v13 }
 0x139   :  { %v331_v15 = vpop.f32.mrb[0].mxu0 }
 0x13a   :  { %v177_v16 = vadd.f32 %v331_v15, %v303_v14  ;;  %v171_v17 = vpop.f32.mrb[1].mxu0 }
 0x13b   :  { %v172_v18 = vadd.f32 %v303_v14, %v171_v17 }
 0x13c   :  { %v183_v19 = vmul.f32 0.70710677, %v177_v16  ;;  %v181_v26 = vmul.f32 0.5, %v177_v16 }
 0x13d   :  { %v182_v20 = vmul.f32 0.70710677, %v172_v18  ;;  %v180_v24 = vmul.f32 0.5, %v172_v18 }
 0x13e   :  { %367 = verf.f32 %v183_v19 }
 0x13f   :  { %369 = verf.f32 %v182_v20 }
 0x148   :  { %v368_v21 = vpop.eup %367 }
 0x149   :  { %v370_v22 = vpop.eup %369  ;;  %v187_v23 = vadd.f32 1.0, %v368_v21 }
 0x14a   :  { %v186_v25 = vadd.f32 1.0, %v370_v22 }
 0x14b   :  { %v189_v28 = vmul.f32 %v187_v23, %v181_v26 }
 0x14c   :  { %v188_v27 = vmul.f32 %v186_v25, %v180_v24 }
 0x14e   :  { %340 = vmatprep.mubr.msk.f32.mxu1 %vm98_vm0, %v188_v27 }
 0x14f   :  { %341 = vmatmul.mubr.msk.f32.vlgmr.msra.gmra.mrb[0].mxu1 %vm98_vm0, %v189_v28 }
 0x222   :  { %v342_v30 = vpop.f32.mrb[0].mxu1 }
 0x223   :  { %v279_v31 = vadd.f32 %v342_v30, %v306_v29  ;;  %v273_v32 = vpop.f32.mrb[1].mxu1 }
 0x224   :  { %v274_v33 = vadd.f32 %v306_v29, %v273_v32 }
 0x225   :  { %283 = vst.msk [vmem:[#allocation11 + $0x8] sm:$0xff] %vm98_vm0, %v279_v31 }
 0x226   :  { %282 = vst.msk [vmem:[#allocation11] sm:$0xff] %vm98_vm0, %v274_v33 }
 0x227   :  { %492 = shalt.err (!%p489_p2)
}
 0x228   :  { %s493_s9 = scalar_lea.hbm %s651_s5, 256 }
 0x229   :  { %p494_p3 = scmp.ne.s32.totalorder %s651_s5, %s493_s9  ;;  %p497_p4 = scmp.lt.u32.totalorder %s493_s9, %s651_s5 }
 0x22b   :  { %p499_p5 = pnand %p497_p4, %p494_p3 }
 0x22d   :  { %502 = shalt.err (!%p499_p5)
}
 0x22e   :  { %295 = dma.vmem_to_hbm [thread:$0]  %s290_s3, 256, %s651_s5, [#allocation4], %s513_s30, %s513_s30, %s514_s6  }
 0x22f   :  { %509 = dma.done.wait [#allocation4], 256  }
 0x230   :  { %510 = vsyncadd [#allocation4], 4294967040 }
 0x231   :  { %299 = vsyncpa [#allocation3], 1 }
 0x232   :  { %300 = vsyncpa [#allocation6], 1 }
 0x233   :  { %301 = vsyncpa [#allocation9], 1 }
 0x234   :  { %302 = vsyncpa [#allocation4], 1 }

</bundles_post_ra>
